<compile_context>
chip_gen: v6e
topology: v6e:2x2x1
jax: 0.10.0
libtpu: 0.0.40
codegen_flags: <defaults>
</compile_context>

<pallas_src>
import functools
import math

import jax
import jax.numpy as jnp
from jax.experimental import pallas as pl
from jax.experimental.pallas import tpu as pltpu


def _round_up(x: int, m: int) -> int:
    return ((x + m - 1) // m) * m


def _pick_f_chunk(fp: int, target: int = 512) -> int:
    """Largest multiple of 128 that divides fp and is <= target."""
    best = 128
    c = 128
    while c <= min(fp, target):
        if fp % c == 0:
            best = c
        c += 128
    return best


def _gelu(x, approx: bool):
    if approx:
        # tanh-approx GELU goes through the EUP slot (cheaper on VALU-bound shapes).
        return jax.nn.gelu(x, approximate=True)
    # PyTorch nn.GELU() default = exact erf-based GELU.
    return 0.5 * x * (1.0 + jax.lax.erf(x * 0.7071067811865476))


def ffn_kernel(x_ref, gamma_ref, beta_ref, w1_ref, b1_ref, w2_ref, b2_ref, o_ref, *,
               add_weight, eps, h_real, f_chunk, n_chunks, approx_gelu):
    # x_ref:  (TM, Hp)      gamma/beta: (1, Hp)
    # w1:     (Hp, Fp)      b1: (1, Fp)
    # w2:     (Fp, Hp)      b2: (1, Hp)
    x = x_ref[...]
    xf = x.astype(jnp.float32)
    tm, h_pad = xf.shape
    inv_h = 1.0 / float(h_real)

    # ---- LayerNorm over the real H lanes (f32 statistics) ----
    # Padded lanes of x are zero, so the raw sum already covers only real lanes;
    # mask the centered values so padding never pollutes the variance.
    mean = jnp.sum(xf, axis=-1, keepdims=True) * inv_h
    if h_pad == h_real:
        xc = xf - mean
    else:
        lane = jax.lax.broadcasted_iota(jnp.int32, xf.shape, 1)
        xc = jnp.where(lane < h_real, xf - mean, 0.0)
    var = jnp.sum(xc * xc, axis=-1, keepdims=True) * inv_h
    xn = xc * jax.lax.rsqrt(var + eps)
    xn = xn * gamma_ref[...].astype(jnp.float32) + beta_ref[...].astype(jnp.float32)

    mm_dtype = w1_ref.dtype           # bf16 by default -> native MXU path
    xn_m = xn.astype(mm_dtype)

    # ---- fc1 + GELU + fc2, chunked over the F axis (f32 accumulation) ----
    def f_block(c, acc):
        if n_chunks == 1:
            w1c, b1c, w2c = w1_ref[...], b1_ref[...], w2_ref[...]
        else:
            start = pl.multiple_of(c * f_chunk, f_chunk)
            w1c = w1_ref[:, pl.ds(start, f_chunk)]
            b1c = b1_ref[:, pl.ds(start, f_chunk)]
            w2c = w2_ref[pl.ds(start, f_chunk), :]
        h = jnp.dot(xn_m, w1c, preferred_element_type=jnp.float32)
        h = h + b1c.astype(jnp.float32)
        h = _gelu(h, approx_gelu)
        # (dropout = identity in eval)
        acc = acc + jnp.dot(h.astype(mm_dtype), w2c,
                            preferred_element_type=jnp.float32)
        return acc

    y0 = jnp.zeros((tm, h_pad), jnp.float32)
    if n_chunks == 1:
        y = f_block(0, y0)
    else:
        y = jax.lax.fori_loop(0, n_chunks, f_block, y0)

    y = y + b2_ref[...].astype(jnp.float32)

    # ---- residual ----
    o_ref[...] = (xf + add_weight * y).astype(o_ref.dtype)


def prepare_params(params, *, matmul_dtype=jnp.bfloat16):
    """One-time padding (lane-dense, multiples of 128) and weight dtype cast."""
    H, F = params["w1"].shape
    Hp = _round_up(H, 128)
    Fp = _round_up(F, 128)
    wdt = params["w1"].dtype if matmul_dtype is None else matmul_dtype
    return {
        "gamma": jnp.pad(params["gamma"], ((0, 0), (0, Hp - H))).astype(jnp.float32),
        "beta":  jnp.pad(params["beta"],  ((0, 0), (0, Hp - H))).astype(jnp.float32),
        "w1":    jnp.pad(params["w1"], ((0, Hp - H), (0, Fp - F))).astype(wdt),
        "b1":    jnp.pad(params["b1"], ((0, 0), (0, Fp - F))).astype(jnp.float32),
        "w2":    jnp.pad(params["w2"], ((0, Fp - F), (0, Hp - H))).astype(wdt),
        "b2":    jnp.pad(params["b2"], ((0, 0), (0, Hp - H))).astype(jnp.float32),
        "h_real": int(H), "f_real": int(F), "h_pad": int(Hp), "f_pad": int(Fp),
    }


def feed_forward_block(hidden, prepared, *, add_weight=1.0, eps=1e-5, tm=512,
                       approx_gelu=False):
    """hidden: (batch, num_patches, hidden_dim) -> same shape."""
    B, N, H = hidden.shape
    assert H == prepared["h_real"]
    Hp, Fp = prepared["h_pad"], prepared["f_pad"]
    T = B * N
    itemsize = jnp.dtype(hidden.dtype).itemsize

    # Token tile: MXU-friendly default, shrink so there are >=2 grid steps on
    # short sequences (lets v7x megacore shard the "parallel" axis across 2 TCs).
    sub = 8 if itemsize >= 4 else 16
    TM = int(tm)
    if T < 2 * TM:
        TM = _round_up(max((T + 1) // 2, sub), sub)
    Tp = _round_up(T, TM)
    n_tiles = Tp // TM

    x2d = jnp.pad(hidden.reshape(T, H), ((0, Tp - T), (0, Hp - H)))

    f_chunk = _pick_f_chunk(Fp)
    n_chunks = Fp // f_chunk

    gamma, beta = prepared["gamma"], prepared["beta"]
    w1, b1, w2, b2 = prepared["w1"], prepared["b1"], prepared["w2"], prepared["b2"]
    wbytes = jnp.dtype(w1.dtype).itemsize

    # Generation-aware VMEM cap (v5e/v6e 128 MiB, v7x 64 MiB), 90% headroom.
    try:
        vmem_cap = int(pltpu.get_tpu_info().vmem_capacity_bytes)
    except Exception:
        vmem_cap = 64 << 20
    vmem_cap = int(0.9 * vmem_cap)

    def _budget(weight_bufs):
        resident = weight_bufs * (2 * Hp * Fp * wbytes + (Fp + 3 * Hp) * 4)
        streamed = 2 * 2 * TM * Hp * itemsize              # x + out, double-buffered
        scratch = 4 * (3 * TM * Hp + TM * f_chunk)         # f32 xf/xn/y + GELU chunk
        scratch += wbytes * (TM * Hp + TM * f_chunk)       # matmul operand casts
        return int(min(max(32 << 20, 1.25 * (resident + streamed + scratch)),
                       vmem_cap))

    cost = pl.CostEstimate(
        flops=int(4 * Tp * Hp * Fp),
        transcendentals=int(Tp * Fp + Tp),
        bytes_accessed=int(2 * Tp * Hp * itemsize + 2 * Hp * Fp * wbytes),
    )

    kernel = functools.partial(
        ffn_kernel, add_weight=float(add_weight), eps=float(eps), h_real=int(H),
        f_chunk=int(f_chunk), n_chunks=int(n_chunks), approx_gelu=bool(approx_gelu))

    def _call(single_buffer_weights):
        def const_spec(shape):
            # Grid-invariant block: fetched once, kept VMEM-resident. Request a
            # single buffer so the default 2-deep pipeline doesn't duplicate it.
            if single_buffer_weights:
                return pl.BlockSpec(shape, lambda i: (0, 0),
                                    pipeline_mode=pl.Buffered(1))
            return pl.BlockSpec(shape, lambda i: (0, 0))

        return pl.pallas_call(
            kernel,
            out_shape=jax.ShapeDtypeStruct((Tp, Hp), hidden.dtype),
            grid=(n_tiles,),
            in_specs=[
                pl.BlockSpec((TM, Hp), lambda i: (i, 0)),   # x     (streamed)
                const_spec((1, Hp)),                        # gamma (resident)
                const_spec((1, Hp)),                        # beta  (resident)
                const_spec((Hp, Fp)),                       # w1    (resident)
                const_spec((1, Fp)),                        # b1    (resident)
                const_spec((Fp, Hp)),                       # w2    (resident)
                const_spec((1, Hp)),                        # b2    (resident)
            ],
            out_specs=pl.BlockSpec((TM, Hp), lambda i: (i, 0)),
            compiler_params=pltpu.CompilerParams(
                dimension_semantics=("parallel",),
                vmem_limit_bytes=_budget(1 if single_buffer_weights else 2),
            ),
            cost_estimate=cost,
        )(x2d, gamma, beta, w1, b1, w2, b2)

    try:
        out2d = jax.block_until_ready(_call(True))
    except Exception:
        # pipeline_mode=pl.Buffered(1) unsupported/rejected -> default pipelining.
        out2d = jax.block_until_ready(_call(False))

    return out2d[:T, :H].reshape(B, N, H)


def init_params(key, hidden_dim, feedforward_dim):
    """Deterministic synthetic parameters matching the PyTorch module's shapes.

    PyTorch stores Linear weights as (out, in); here we pre-transpose to (in, out).
    """
    k1, k2, k3, k4 = jax.random.split(key, 4)
    bound1 = 1.0 / math.sqrt(hidden_dim)
    bound2 = 1.0 / math.sqrt(feedforward_dim)
    return {
        "gamma": jnp.ones((1, hidden_dim), jnp.float32),
        "beta": jnp.zeros((1, hidden_dim), jnp.float32),
        "w1": jax.random.uniform(k1, (hidden_dim, feedforward_dim),
                                 jnp.float32, -bound1, bound1),
        "b1": jax.random.uniform(k2, (1, feedforward_dim),
                                 jnp.float32, -bound1, bound1),
        "w2": jax.random.uniform(k3, (feedforward_dim, hidden_dim),
                                 jnp.float32, -bound2, bound2),
        "b2": jax.random.uniform(k4, (1, hidden_dim),
                                 jnp.float32, -bound2, bound2),
    }


def reference(hidden, params, *, add_weight=1.0, eps=1e-5):
    x = hidden.astype(jnp.float32)
    mean = jnp.mean(x, axis=-1, keepdims=True)
    var = jnp.mean((x - mean) ** 2, axis=-1, keepdims=True)
    xn = (x - mean) * jax.lax.rsqrt(var + eps) * params["gamma"][0] + params["beta"][0]
    h = xn @ params["w1"] + params["b1"][0]
    h = 0.5 * h * (1.0 + jax.lax.erf(h / jnp.sqrt(2.0)))
    y = h @ params["w2"] + params["b2"][0]
    return (x + add_weight * y).astype(hidden.dtype)


if __name__ == "__main__":
    batch, num_patches, hidden_dim = 2, 8, 32
    feedforward_dim = hidden_dim * 4  # 128
    add_weight = 1.0

    key = jax.random.PRNGKey(0)
    k_x, k_p = jax.random.split(key)
    hidden = jax.random.normal(k_x, (batch, num_patches, hidden_dim), jnp.float32)
    params = init_params(k_p, hidden_dim, feedforward_dim)
    ref = reference(hidden, params, add_weight=add_weight)

    # f32 matmul path: tight check of LN / GELU / residual / padding-mask math.
    prep_f32 = prepare_params(params, matmul_dtype=None)
    out_f32 = jax.block_until_ready(
        feed_forward_block(hidden, prep_f32, add_weight=add_weight))
    assert out_f32.shape == (batch, num_patches, hidden_dim)
    assert jnp.allclose(out_f32, ref, atol=1e-4, rtol=1e-4), "f32 mismatch vs reference"

    # bf16 matmul path (default, MXU-native): looser tolerance for bf16 operands.
    prep_bf16 = prepare_params(params)  # matmul_dtype=bfloat16
    out_bf16 = jax.block_until_ready(
        feed_forward_block(hidden, prep_bf16, add_weight=add_weight))
    assert out_bf16.shape == (batch, num_patches, hidden_dim)
    assert jnp.allclose(out_bf16, ref, atol=3e-2, rtol=3e-2), "bf16 mismatch vs reference"

    print("KERNEL_OK")
</pallas_src>

<mosaic_0001>
module attributes {stable_mosaic.version = 11 : i64} {
  func.func @ffn_kernel(%arg0: i32, %arg1: memref<8x128xf32, #tpu.memory_space<vmem>>, %arg2: memref<1x128xf32, #tpu.memory_space<vmem>>, %arg3: memref<1x128xf32, #tpu.memory_space<vmem>>, %arg4: memref<128x128xf32, #tpu.memory_space<vmem>>, %arg5: memref<1x128xf32, #tpu.memory_space<vmem>>, %arg6: memref<128x128xf32, #tpu.memory_space<vmem>>, %arg7: memref<1x128xf32, #tpu.memory_space<vmem>>, %arg8: memref<8x128xf32, #tpu.memory_space<vmem>>) attributes {dimension_semantics = [#tpu.dimension_semantics<parallel>], iteration_bounds = array<i64: 2>, scalar_prefetch = 0 : i64, scratch_operands = 0 : i64, tpu.core_type = #tpu.core_type<tc>, window_params = [{transform_indices = @transform_0, window_bounds = array<i64: 8, 128>}, {pipeline_mode = #tpu.pipeline_mode<synchronous>, transform_indices = @transform_1, window_bounds = array<i64: 1, 128>}, {pipeline_mode = #tpu.pipeline_mode<synchronous>, transform_indices = @transform_2, window_bounds = array<i64: 1, 128>}, {pipeline_mode = #tpu.pipeline_mode<synchronous>, transform_indices = @transform_3, window_bounds = array<i64: 128, 128>}, {pipeline_mode = #tpu.pipeline_mode<synchronous>, transform_indices = @transform_4, window_bounds = array<i64: 1, 128>}, {pipeline_mode = #tpu.pipeline_mode<synchronous>, transform_indices = @transform_5, window_bounds = array<i64: 128, 128>}, {pipeline_mode = #tpu.pipeline_mode<synchronous>, transform_indices = @transform_6, window_bounds = array<i64: 1, 128>}, {transform_indices = @transform_7, window_bounds = array<i64: 8, 128>}]} {
    %c0 = arith.constant 0 : index
    %c0_0 = arith.constant 0 : index
    %0 = vector.load %arg1[%c0, %c0_0] : memref<8x128xf32, #tpu.memory_space<vmem>>, vector<8x128xf32>
    %cst = arith.constant dense<0.000000e+00> : vector<8xf32>
    %1 = vector.multi_reduction <add>, %0, %cst [1] : vector<8x128xf32> to vector<8xf32>
    %2 = vector.shape_cast %1 : vector<8xf32> to vector<8x1xf32>
    %cst_1 = arith.constant 3.125000e-02 : f32
    %3 = vector.broadcast %cst_1 : f32 to vector<8x1xf32>
    %4 = arith.mulf %2, %3 : vector<8x1xf32>
    %5 = tpu.iota {dimensions = array<i32: 1>} : vector<8x128xi32>
    %c32_i32 = arith.constant 32 : i32
    %6 = vector.broadcast %c32_i32 : i32 to vector<8x128xi32>
    %7 = arith.cmpi slt, %5, %6 : vector<8x128xi32>
    %8 = vector.broadcast %4 : vector<8x1xf32> to vector<8x128xf32>
    %9 = arith.subf %0, %8 : vector<8x128xf32>
    %cst_2 = arith.constant 0.000000e+00 : f32
    %10 = vector.broadcast %cst_2 : f32 to vector<8x128xf32>
    %11 = arith.select %7, %9, %10 : vector<8x128xi1>, vector<8x128xf32>
    %12 = arith.mulf %11, %11 : vector<8x128xf32>
    %cst_3 = arith.constant dense<0.000000e+00> : vector<8xf32>
    %13 = vector.multi_reduction <add>, %12, %cst_3 [1] : vector<8x128xf32> to vector<8xf32>
    %14 = vector.shape_cast %13 : vector<8xf32> to vector<8x1xf32>
    %cst_4 = arith.constant 3.125000e-02 : f32
    %15 = vector.broadcast %cst_4 : f32 to vector<8x1xf32>
    %16 = arith.mulf %14, %15 : vector<8x1xf32>
    %cst_5 = arith.constant 9.99999974E-6 : f32
    %17 = vector.broadcast %cst_5 : f32 to vector<8x1xf32>
    %18 = arith.addf %16, %17 : vector<8x1xf32>
    %19 = math.rsqrt %18 : vector<8x1xf32>
    %20 = vector.broadcast %19 : vector<8x1xf32> to vector<8x128xf32>
    %21 = arith.mulf %11, %20 : vector<8x128xf32>
    %c0_6 = arith.constant 0 : index
    %c0_7 = arith.constant 0 : index
    %22 = vector.load %arg2[%c0_6, %c0_7] : memref<1x128xf32, #tpu.memory_space<vmem>>, vector<1x128xf32>
    %23 = vector.broadcast %22 : vector<1x128xf32> to vector<8x128xf32>
    %24 = arith.mulf %21, %23 : vector<8x128xf32>
    %c0_8 = arith.constant 0 : index
    %c0_9 = arith.constant 0 : index
    %25 = vector.load %arg3[%c0_8, %c0_9] : memref<1x128xf32, #tpu.memory_space<vmem>>, vector<1x128xf32>
    %26 = vector.broadcast %25 : vector<1x128xf32> to vector<8x128xf32>
    %27 = arith.addf %24, %26 : vector<8x128xf32>
    %cst_10 = arith.constant 0.000000e+00 : f32
    %28 = vector.broadcast %cst_10 : f32 to vector<8x128xf32>
    %c0_11 = arith.constant 0 : index
    %c0_12 = arith.constant 0 : index
    %29 = vector.load %arg4[%c0_11, %c0_12] : memref<128x128xf32, #tpu.memory_space<vmem>>, vector<128x128xf32>
    %c0_13 = arith.constant 0 : index
    %c0_14 = arith.constant 0 : index
    %30 = vector.load %arg5[%c0_13, %c0_14] : memref<1x128xf32, #tpu.memory_space<vmem>>, vector<1x128xf32>
    %c0_15 = arith.constant 0 : index
    %c0_16 = arith.constant 0 : index
    %31 = vector.load %arg6[%c0_15, %c0_16] : memref<128x128xf32, #tpu.memory_space<vmem>>, vector<128x128xf32>
    %cst_17 = arith.constant dense<0.000000e+00> : vector<8x128xf32>
    %32 = tpu.matmul %27, %29, %cst_17 {dimension_numbers = #tpu.dot_dimension_numbers<[1], [0], [0], [1], [0, 0, 1, 1], [], []>} : vector<8x128xf32>, vector<128x128xf32>, vector<8x128xf32> -> vector<8x128xf32>
    %33 = vector.broadcast %30 : vector<1x128xf32> to vector<8x128xf32>
    %34 = arith.addf %32, %33 : vector<8x128xf32>
    %cst_18 = arith.constant 5.000000e-01 : f32
    %35 = vector.broadcast %cst_18 : f32 to vector<8x128xf32>
    %36 = arith.mulf %35, %34 : vector<8x128xf32>
    %cst_19 = arith.constant 0.707106769 : f32
    %37 = vector.broadcast %cst_19 : f32 to vector<8x128xf32>
    %38 = arith.mulf %34, %37 : vector<8x128xf32>
    %39 = math.erf %38 : vector<8x128xf32>
    %cst_20 = arith.constant 1.000000e+00 : f32
    %40 = vector.broadcast %cst_20 : f32 to vector<8x128xf32>
    %41 = arith.addf %40, %39 : vector<8x128xf32>
    %42 = arith.mulf %36, %41 : vector<8x128xf32>
    %cst_21 = arith.constant dense<0.000000e+00> : vector<8x128xf32>
    %43 = tpu.matmul %42, %31, %cst_21 {dimension_numbers = #tpu.dot_dimension_numbers<[1], [0], [0], [1], [0, 0, 1, 1], [], []>} : vector<8x128xf32>, vector<128x128xf32>, vector<8x128xf32> -> vector<8x128xf32>
    %44 = arith.addf %28, %43 : vector<8x128xf32>
    %c0_22 = arith.constant 0 : index
    %c0_23 = arith.constant 0 : index
    %45 = vector.load %arg7[%c0_22, %c0_23] : memref<1x128xf32, #tpu.memory_space<vmem>>, vector<1x128xf32>
    %46 = vector.broadcast %45 : vector<1x128xf32> to vector<8x128xf32>
    %47 = arith.addf %44, %46 : vector<8x128xf32>
    %cst_24 = arith.constant 1.000000e+00 : f32
    %48 = vector.broadcast %cst_24 : f32 to vector<8x128xf32>
    %49 = arith.mulf %48, %47 : vector<8x128xf32>
    %50 = arith.addf %0, %49 : vector<8x128xf32>
    %c0_25 = arith.constant 0 : index
    %c0_26 = arith.constant 0 : index
    %51 = vector.load %arg8[%c0_25, %c0_26] : memref<8x128xf32, #tpu.memory_space<vmem>>, vector<8x128xf32>
    tpu.vector_store %arg8[%c0_25, %c0_26], %50 {strides = array<i32>} : memref<8x128xf32, #tpu.memory_space<vmem>>, vector<8x128xf32>,
    return
  }
  func.func @transform_0(%arg0: i32) -> (i32, i32) {
    %c0_i32 = arith.constant 0 : i32
    %c0_i32_0 = arith.constant 0 : i32
    return %arg0, %c0_i32 : i32, i32
  }
  func.func @transform_1(%arg0: i32) -> (i32, i32) {
    %c0_i32 = arith.constant 0 : i32
    %c0_i32_0 = arith.constant 0 : i32
    %c0_i32_1 = arith.constant 0 : i32
    return %c0_i32, %c0_i32_0 : i32, i32
  }
  func.func @transform_2(%arg0: i32) -> (i32, i32) {
    %c0_i32 = arith.constant 0 : i32
    %c0_i32_0 = arith.constant 0 : i32
    %c0_i32_1 = arith.constant 0 : i32
    return %c0_i32, %c0_i32_0 : i32, i32
  }
  func.func @transform_3(%arg0: i32) -> (i32, i32) {
    %c0_i32 = arith.constant 0 : i32
    %c0_i32_0 = arith.constant 0 : i32
    %c0_i32_1 = arith.constant 0 : i32
    return %c0_i32, %c0_i32_0 : i32, i32
  }
  func.func @transform_4(%arg0: i32) -> (i32, i32) {
    %c0_i32 = arith.constant 0 : i32
    %c0_i32_0 = arith.constant 0 : i32
    %c0_i32_1 = arith.constant 0 : i32
    return %c0_i32, %c0_i32_0 : i32, i32
  }
  func.func @transform_5(%arg0: i32) -> (i32, i32) {
    %c0_i32 = arith.constant 0 : i32
    %c0_i32_0 = arith.constant 0 : i32
    %c0_i32_1 = arith.constant 0 : i32
    return %c0_i32, %c0_i32_0 : i32, i32
  }
  func.func @transform_6(%arg0: i32) -> (i32, i32) {
    %c0_i32 = arith.constant 0 : i32
    %c0_i32_0 = arith.constant 0 : i32
    %c0_i32_1 = arith.constant 0 : i32
    return %c0_i32, %c0_i32_0 : i32, i32
  }
  func.func @transform_7(%arg0: i32) -> (i32, i32) {
    %c0_i32 = arith.constant 0 : i32
    %c0_i32_0 = arith.constant 0 : i32
    return %arg0, %c0_i32 : i32, i32
  }
}

module attributes {stable_mosaic.version = 11 : i64} {
  func.func @ffn_kernel(%arg0: i32, %arg1: memref<8x128xf32, #tpu.memory_space<vmem>>, %arg2: memref<1x128xf32, #tpu.memory_space<vmem>>, %arg3: memref<1x128xf32, #tpu.memory_space<vmem>>, %arg4: memref<128x128xf32, #tpu.memory_space<vmem>>, %arg5: memref<1x128xf32, #tpu.memory_space<vmem>>, %arg6: memref<128x128xf32, #tpu.memory_space<vmem>>, %arg7: memref<1x128xf32, #tpu.memory_space<vmem>>, %arg8: memref<8x128xf32, #tpu.memory_space<vmem>>) attributes {dimension_semantics = [#tpu.dimension_semantics<parallel>], iteration_bounds = array<i64: 2>, scalar_prefetch = 0 : i64, scratch_operands = 0 : i64, tpu.core_type = #tpu.core_type<tc>, window_params = [{transform_indices = @transform_0, window_bounds = array<i64: 8, 128>}, {pipeline_mode = #tpu.pipeline_mode<synchronous>, transform_indices = @transform_1, window_bounds = array<i64: 1, 128>}, {pipeline_mode = #tpu.pipeline_mode<synchronous>, transform_indices = @transform_2, window_bounds = array<i64: 1, 128>}, {pipeline_mode = #tpu.pipeline_mode<synchronous>, transform_indices = @transform_3, window_bounds = array<i64: 128, 128>}, {pipeline_mode = #tpu.pipeline_mode<synchronous>, transform_indices = @transform_4, window_bounds = array<i64: 1, 128>}, {pipeline_mode = #tpu.pipeline_mode<synchronous>, transform_indices = @transform_5, window_bounds = array<i64: 128, 128>}, {pipeline_mode = #tpu.pipeline_mode<synchronous>, transform_indices = @transform_6, window_bounds = array<i64: 1, 128>}, {transform_indices = @transform_7, window_bounds = array<i64: 8, 128>}]} {
    %c0 = arith.constant 0 : index
    %c0_0 = arith.constant 0 : index
    %0 = vector.load %arg1[%c0, %c0_0] : memref<8x128xf32, #tpu.memory_space<vmem>>, vector<8x128xf32>
    %cst = arith.constant dense<0.000000e+00> : vector<8xf32>
    %1 = vector.multi_reduction <add>, %0, %cst [1] : vector<8x128xf32> to vector<8xf32>
    %2 = vector.shape_cast %1 : vector<8xf32> to vector<8x1xf32>
    %cst_1 = arith.constant 3.125000e-02 : f32
    %3 = vector.broadcast %cst_1 : f32 to vector<8x1xf32>
    %4 = arith.mulf %2, %3 : vector<8x1xf32>
    %5 = tpu.iota {dimensions = array<i32: 1>} : vector<8x128xi32>
    %c32_i32 = arith.constant 32 : i32
    %6 = vector.broadcast %c32_i32 : i32 to vector<8x128xi32>
    %7 = arith.cmpi slt, %5, %6 : vector<8x128xi32>
    %8 = vector.broadcast %4 : vector<8x1xf32> to vector<8x128xf32>
    %9 = arith.subf %0, %8 : vector<8x128xf32>
    %cst_2 = arith.constant 0.000000e+00 : f32
    %10 = vector.broadcast %cst_2 : f32 to vector<8x128xf32>
    %11 = arith.select %7, %9, %10 : vector<8x128xi1>, vector<8x128xf32>
    %12 = arith.mulf %11, %11 : vector<8x128xf32>
    %cst_3 = arith.constant dense<0.000000e+00> : vector<8xf32>
    %13 = vector.multi_reduction <add>, %12, %cst_3 [1] : vector<8x128xf32> to vector<8xf32>
    %14 = vector.shape_cast %13 : vector<8xf32> to vector<8x1xf32>
    %cst_4 = arith.constant 3.125000e-02 : f32
    %15 = vector.broadcast %cst_4 : f32 to vector<8x1xf32>
    %16 = arith.mulf %14, %15 : vector<8x1xf32>
    %cst_5 = arith.constant 9.99999974E-6 : f32
    %17 = vector.broadcast %cst_5 : f32 to vector<8x1xf32>
    %18 = arith.addf %16, %17 : vector<8x1xf32>
    %19 = math.rsqrt %18 : vector<8x1xf32>
    %20 = vector.broadcast %19 : vector<8x1xf32> to vector<8x128xf32>
    %21 = arith.mulf %11, %20 : vector<8x128xf32>
    %c0_6 = arith.constant 0 : index
    %c0_7 = arith.constant 0 : index
    %22 = vector.load %arg2[%c0_6, %c0_7] : memref<1x128xf32, #tpu.memory_space<vmem>>, vector<1x128xf32>
    %23 = vector.broadcast %22 : vector<1x128xf32> to vector<8x128xf32>
    %24 = arith.mulf %21, %23 : vector<8x128xf32>
    %c0_8 = arith.constant 0 : index
    %c0_9 = arith.constant 0 : index
    %25 = vector.load %arg3[%c0_8, %c0_9] : memref<1x128xf32, #tpu.memory_space<vmem>>, vector<1x128xf32>
    %26 = vector.broadcast %25 : vector<1x128xf32> to vector<8x128xf32>
    %27 = arith.addf %24, %26 : vector<8x128xf32>
    %cst_10 = arith.constant 0.000000e+00 : f32
    %28 = vector.broadcast %cst_10 : f32 to vector<8x128xf32>
    %c0_11 = arith.constant 0 : index
    %c0_12 = arith.constant 0 : index
    %29 = vector.load %arg4[%c0_11, %c0_12] : memref<128x128xf32, #tpu.memory_space<vmem>>, vector<128x128xf32>
    %c0_13 = arith.constant 0 : index
    %c0_14 = arith.constant 0 : index
    %30 = vector.load %arg5[%c0_13, %c0_14] : memref<1x128xf32, #tpu.memory_space<vmem>>, vector<1x128xf32>
    %c0_15 = arith.constant 0 : index
    %c0_16 = arith.constant 0 : index
    %31 = vector.load %arg6[%c0_15, %c0_16] : memref<128x128xf32, #tpu.memory_space<vmem>>, vector<128x128xf32>
    %cst_17 = arith.constant dense<0.000000e+00> : vector<8x128xf32>
    %32 = tpu.matmul %27, %29, %cst_17 {dimension_numbers = #tpu.dot_dimension_numbers<[1], [0], [0], [1], [0, 0, 1, 1], [], []>} : vector<8x128xf32>, vector<128x128xf32>, vector<8x128xf32> -> vector<8x128xf32>
    %33 = vector.broadcast %30 : vector<1x128xf32> to vector<8x128xf32>
    %34 = arith.addf %32, %33 : vector<8x128xf32>
    %cst_18 = arith.constant 5.000000e-01 : f32
    %35 = vector.broadcast %cst_18 : f32 to vector<8x128xf32>
    %36 = arith.mulf %35, %34 : vector<8x128xf32>
    %cst_19 = arith.constant 0.707106769 : f32
    %37 = vector.broadcast %cst_19 : f32 to vector<8x128xf32>
    %38 = arith.mulf %34, %37 : vector<8x128xf32>
    %39 = math.erf %38 : vector<8x128xf32>
    %cst_20 = arith.constant 1.000000e+00 : f32
    %40 = vector.broadcast %cst_20 : f32 to vector<8x128xf32>
    %41 = arith.addf %40, %39 : vector<8x128xf32>
    %42 = arith.mulf %36, %41 : vector<8x128xf32>
    %cst_21 = arith.constant dense<0.000000e+00> : vector<8x128xf32>
    %43 = tpu.matmul %42, %31, %cst_21 {dimension_numbers = #tpu.dot_dimension_numbers<[1], [0], [0], [1], [0, 0, 1, 1], [], []>} : vector<8x128xf32>, vector<128x128xf32>, vector<8x128xf32> -> vector<8x128xf32>
    %44 = arith.addf %28, %43 : vector<8x128xf32>
    %c0_22 = arith.constant 0 : index
    %c0_23 = arith.constant 0 : index
    %45 = vector.load %arg7[%c0_22, %c0_23] : memref<1x128xf32, #tpu.memory_space<vmem>>, vector<1x128xf32>
    %46 = vector.broadcast %45 : vector<1x128xf32> to vector<8x128xf32>
    %47 = arith.addf %44, %46 : vector<8x128xf32>
    %cst_24 = arith.constant 1.000000e+00 : f32
    %48 = vector.broadcast %cst_24 : f32 to vector<8x128xf32>
    %49 = arith.mulf %48, %47 : vector<8x128xf32>
    %50 = arith.addf %0, %49 : vector<8x128xf32>
    %c0_25 = arith.constant 0 : index
    %c0_26 = arith.constant 0 : index
    %51 = vector.load %arg8[%c0_25, %c0_26] : memref<8x128xf32, #tpu.memory_space<vmem>>, vector<8x128xf32>
    tpu.vector_store %arg8[%c0_25, %c0_26], %50 {strides = array<i32>} : memref<8x128xf32, #tpu.memory_space<vmem>>, vector<8x128xf32>,
    return
  }
  func.func @transform_0(%arg0: i32) -> (i32, i32) {
    %c0_i32 = arith.constant 0 : i32
    %c0_i32_0 = arith.constant 0 : i32
    return %arg0, %c0_i32 : i32, i32
  }
  func.func @transform_1(%arg0: i32) -> (i32, i32) {
    %c0_i32 = arith.constant 0 : i32
    %c0_i32_0 = arith.constant 0 : i32
    %c0_i32_1 = arith.constant 0 : i32
    return %c0_i32, %c0_i32_0 : i32, i32
  }
  func.func @transform_2(%arg0: i32) -> (i32, i32) {
    %c0_i32 = arith.constant 0 : i32
    %c0_i32_0 = arith.constant 0 : i32
    %c0_i32_1 = arith.constant 0 : i32
    return %c0_i32, %c0_i32_0 : i32, i32
  }
  func.func @transform_3(%arg0: i32) -> (i32, i32) {
    %c0_i32 = arith.constant 0 : i32
    %c0_i32_0 = arith.constant 0 : i32
    %c0_i32_1 = arith.constant 0 : i32
    return %c0_i32, %c0_i32_0 : i32, i32
  }
  func.func @transform_4(%arg0: i32) -> (i32, i32) {
    %c0_i32 = arith.constant 0 : i32
    %c0_i32_0 = arith.constant 0 : i32
    %c0_i32_1 = arith.constant 0 : i32
    return %c0_i32, %c0_i32_0 : i32, i32
  }
  func.func @transform_5(%arg0: i32) -> (i32, i32) {
    %c0_i32 = arith.constant 0 : i32
    %c0_i32_0 = arith.constant 0 : i32
    %c0_i32_1 = arith.constant 0 : i32
    return %c0_i32, %c0_i32_0 : i32, i32
  }
  func.func @transform_6(%arg0: i32) -> (i32, i32) {
    %c0_i32 = arith.constant 0 : i32
    %c0_i32_0 = arith.constant 0 : i32
    %c0_i32_1 = arith.constant 0 : i32
    return %c0_i32, %c0_i32_0 : i32, i32
  }
  func.func @transform_7(%arg0: i32) -> (i32, i32) {
    %c0_i32 = arith.constant 0 : i32
    %c0_i32_0 = arith.constant 0 : i32
    return %arg0, %c0_i32 : i32, i32
  }
}

</mosaic_0001>

<bundles_post_ra>
// kernel: tpu_custom_call.1
= control target key start
LH: loop header
LB: loop body
LE: loop exit
PB: predicated region body
PF: predicated region fallthrough
CT: control target
= control target key end

     0   :  { %s1268_s0 = inlined_call_operand.hbm [shape: f32[16,128], index: 0, kind: input, shape index: {}]   ;;  %s1269_s1 = inlined_call_operand.vmem [shape: f32[1,128], index: 1, kind: input, shape index: {}]   ;;  %s1270_s2 = inlined_call_operand.vmem [shape: f32[1,128], index: 2, kind: input, shape index: {}]   ;;  %s1271_s3 = inlined_call_operand.hbm [shape: f32[128,128], index: 3, kind: input, shape index: {}]   ;;  %s1272_s4 = inlined_call_operand.vmem [shape: f32[1,128], index: 4, kind: input, shape index: {}]   ;;  %s1273_s5 = inlined_call_operand.hbm [shape: f32[128,128], index: 5, kind: input, shape index: {}]   ;;  %s1274_s6 = inlined_call_operand.vmem [shape: f32[1,128], index: 6, kind: input, shape index: {}]   ;;  %s1275_s7 = inlined_call_operand.hbm [shape: f32[16,128], index: 7, kind: output, shape index: {}]  }
   0x1   :  { %1280 = sst [smem:[#allocation12_spill]] %s1271_s3 }
   0x2   :  { %1281 = sst [smem:[#allocation13_spill]] %s1273_s5 }
   0x3   :  { %12 = vsyncpa [#allocation3], 0 }
   0x4   :  { %14 = vsyncpa [#allocation3 + $0x1], 0 }
   0x5   :  { %15 = vsyncpa [#allocation6], 0 }
   0x6   :  { %16 = vsyncpa [#allocation4], 0 }
   0x7   :  { %18 = vsyncpa [#allocation4 + $0x1], 0  ;;  %s1048_s24 = smov 0   ;;  %s1050_s25 = smov 0  }
   0x8   :  { %s1052_s26 = smov 0   ;;  %s1054_s27 = smov 0  }
   0x9 LB: > { %s1069_s28 = sadd.s32 4294967295, %s998_s27   ;;  %s651_s29 = sadd.s32 4294967294, %s998_s27   ;;  %s998_s27 = sphi %s1054_s27, %s1301_s27   ;;  %s994_s26 = sphi %s1052_s26, %s1300_s26   ;;  %s990_s25 = sphi %s1050_s25, %s1299_s25   ;;  %s986_s24 = sphi %s1048_s24, %s1298_s24  }
   0xa   : > { %p44_p0 = scmp.ne.s32.totalorder %s990_s25, %s986_s24  ;;  %p1276_p1 = scmp.eq.s32.totalorder %s1069_s28, 0 }
   0xb   : > { %p200_p3 = scmp.eq.s32.totalorder %s651_s29, 1  ;;  %p652_p5 = scmp.ge.s32.totalorder %s998_s27, 1 }
   0xc   : > { %p1078_p4 = por %p1276_p1, %p44_p0  ;;  %p207_p7 = scmp.lt.s32.totalorder %s998_s27, 3 }
   0xd   : > { %p1083_p6 = por %p200_p3, %p44_p0  ;;  %s1000_s10 = smov [#allocation5]  }
   0xe   : > { %s1282_s30 = scalar_select %p1078_p4, 1, 0 }
   0xf   : > { %s1283_s8 = scalar_select %p1083_p6, 1, 0 }
  0x10   : > { %p1088_p8 = pnand %p652_p5, %p207_p7  ;;  %s225_s11 = sshll.u32 %s1000_s10, 4  ;;  %s226_s11 = int_to_ptr.vmem [resolvable:$true] %s225_s11 }
  0x11   : > { %s1001_s13 = smov [#allocation7]   ;;  %s861_s15 = scalar_lea.vmem %s226_s11, 2048 }
  0x12   : > { %s1284_s9 = scalar_select %p1088_p8, 1, 0 }
  0x13   : > { %p787_p9 = pneg %p1088_p8  ;;  %s241_s14 = sshll.u32 %s1001_s13, 4  ;;  %s242_s14 = int_to_ptr.vmem [resolvable:$true] %s241_s14 }
  0x14   : > { %p862_p13 = scmp.ne.s32.totalorder %s226_s11, %s861_s15  ;;  %p869_p5 = scmp.lt.s32.totalorder %s226_s11, %s226_s11 }
  0x15   : > { %p1097_p11 = pnand %p787_p9, %p1276_p1  ;;  %p870_p7 = scmp.lt.s32.totalorder %s861_s15, %s861_s15 }
  0x17   : > { %p852_p12 = pneg %p1097_p11  ;;  %p871_p10 = por %p870_p7, %p869_p5 }
  0x19   : > { %p864_p0 = pnand %p862_p13, %p852_p12 }
  0x1b   : > { %p865_p3 = pneg %p864_p0 }
  0x1d   : > { %p872_p9 = pnand %p871_p10, %p865_p3 }
  0x1f   : > { %875 = shalt.err (!%p872_p9)
}
  0x20   : > { %s1002_s16 = smov 128   ;;  %s1003_s17 = smov 8  }
  0x21   : > { %s1286_s3 = sld [smem:[#allocation12_spill]]  ;;  %s887_s20 = scalar_lea.vmem %s242_s14, 2048 }
  0x22   : > { %p888_p1 = scmp.ne.s32.totalorder %s242_s14, %s887_s20  ;;  %p895_p2 = scmp.lt.s32.totalorder %s242_s14, %s242_s14 }
  0x23   : > { %p896_p6 = scmp.lt.s32.totalorder %s887_s20, %s887_s20 }
  0x24   : > { %p890_p13 = pnand %p888_p1, %p852_p12 }
  0x25   : > { %p897_p5 = por %p896_p6, %p895_p2 }
  0x26   : > { %p891_p0 = pneg %p890_p13 }
  0x27   : > { %790 = dma.hbm_to_vmem [thread:$0]  (!%p1097_p11), %s1286_s3, 2048, %s226_s11, [#allocation6], %s1002_s16, %s1002_s16, %s1003_s17  }
  0x28   : > { %p898_p10 = pnand %p897_p5, %p891_p0 }
  0x2a   : > { %901 = shalt.err (!%p898_p10)
}
  0x2b   : > { %s1287_s5 = sld [smem:[#allocation13_spill]]  ;;  %s1120_s23 = sadd.s32 1, %s998_s27  }
  0x2c   : > { %s31_s29 = sadd.s32 1, %s994_s26  ;;  %s28_s10 = ssub.s32 %s998_s27, %s1120_s23 }
  0x2d   : > { %p38_p1 = scmp.ne.s32.totalorder %s994_s26, %s990_s25  ;;  %p29_p2 = scmp.eq.s32.totalorder %s28_s10, 0 }
  0x2e   : > { %p39_p6 = scmp.eq.s32.totalorder %s998_s27, 0  ;;  %p1288_p12 = scmp.eq.s32.totalorder %s1069_s28, 1 }
  0x2f   : > { %p804_p7 = scmp.lt.s32.totalorder %s998_s27, 2  ;;  %s258_s13 = sand.u32 1, %s994_s26  }
  0x30   : > { %p1130_p3 = por %p1288_p12, %p38_p1  ;;  %p40_p9 = por %p39_p6, %p38_p1 }
  0x31   : > { %793 = dma.hbm_to_vmem [thread:$0]  (!%p1097_p11), %s1287_s5, 2048, %s242_s14, [#allocation6], %s1002_s16, %s1002_s16, %s1003_s17  }
  0x32   : > { %s1289_s11 = scalar_select %p1130_p3, 1, 0 }
  0x33   : > { %s1136_s12 = scalar_select %p29_p2, %s994_s26, %s31_s29  }
  0x34   : > { %s656_s15 = sshll.u32 %s258_s13, 3  ;;  %s657_s14 = sshll.u32 %s998_s27, 7 }
  0x35   : > { %s1143_s18 = scalar_lea.hbm %s1268_s0, %s657_s14  ;;  %s262_s19 = scalar_lea.vmem [#allocation2], %s656_s15 }
  0x36   : > { %s269_s20 = sshll.u32 %s262_s19, 4  ;;  %p1145_p11 = pnand %p804_p7, %p40_p9  ;;  %s270_s20 = int_to_ptr.vmem [resolvable:$true] %s269_s20 }
  0x37   : > { %s259_s22 = scalar_lea.sflag [#allocation3], %s258_s13  ;;  %s902_s29 = scalar_lea.hbm %s1143_s18, 128 }
  0x38   : > { %p903_p13 = scmp.ne.s32.totalorder %s1143_s18, %s902_s29  ;;  %p904_p0 = pneg %p1145_p11 }
  0x39   : > { %s907_s16 = scalar_lea.hbm %s1268_s0, 256  ;;  %p908_p1 = scmp.lt.s32.totalorder %s1143_s18, %s1268_s0 }
  0x3a   : > { %p905_p5 = pnand %p904_p0, %p903_p13  ;;  %p909_p2 = scmp.lt.s32.totalorder %s907_s16, %s902_s29 }
  0x3c   : > { %p906_p10 = pneg %p905_p5  ;;  %p910_p6 = por %p909_p2, %p908_p1 }
  0x3e   : > { %p911_p12 = pnand %p910_p6, %p906_p10 }
  0x40   : > { %914 = shalt.err (!%p911_p12)
}
  0x41   : > { %s915_s19 = scalar_lea.vmem %s270_s20, 128  ;;  %s1004_s13 = smov [#allocation2]  }
  0x42   : > { %p916_p7 = scmp.ne.s32.totalorder %s270_s20, %s915_s19  ;;  %s920_s3 = sshll.u32 %s1004_s13, 4  ;;  %s921_s3 = int_to_ptr.vmem [resolvable:$false] %s920_s3 }
  0x43   : > { %s922_s5 = scalar_lea.vmem %s921_s3, 256  ;;  %p923_p13 = scmp.lt.s32.totalorder %s270_s20, %s921_s3 }
  0x44   : > { %p918_p9 = pnand %p916_p7, %p904_p0  ;;  %p924_p5 = scmp.lt.s32.totalorder %s922_s5, %s915_s19 }
  0x46   : > { %p919_p3 = pneg %p918_p9  ;;  %p925_p4 = por %p924_p5, %p923_p13 }
  0x48   : > { %p926_p8 = pnand %p925_p4, %p919_p3 }
  0x4a   : > { %929 = shalt.err (!%p926_p8)
}
  0x4b   : > { %797 = dma.hbm_to_vmem [thread:$0]  (!%p1145_p11), %s1143_s18, 128, %s270_s20, %s259_s22  }
  0x4c   : > { %p1291_p10 = scmp.ne.s32.totalorder %s1284_s9, 0 }
  0x4d   : > { %s1166_s29 = sand.u32 (!%p1291_p10), 1, %s990_s25   ;;  %p1292_p4 = scmp.ne.s32.totalorder (!%p1291_p10), %s1282_s30, 0 }
  0x4e   : > { %278 = sbr.rel (%p1291_p10) target bundleno = 820 (0x334), region = 48  ;;  %s659_s10 = sshll.u32 (!%p1291_p10), %s1166_s29, 3 }
  0x4f   : > { %s281_s3 = scalar_lea.sflag (!%p1291_p10), [#allocation3], %s1166_s29  ;;  %s284_s5 = scalar_lea.vmem (!%p1291_p10), [#allocation2], %s659_s10 }
  0x53   : > { %973 = dma.done.wait (%p1292_p4), %s281_s3, 128  }
  0x54   : > { %975 = vsyncadd (%p1292_p4), %s281_s3, 4294967168  ;;  %p1293_p8 = scmp.eq.s32.totalorder %s1069_s28, 0 }
  0x56   : > { %977 = dma.done.wait (%p1293_p8), [#allocation6], 4096   ;;  %p1294_p3 = pmov %p1293_p8 }
  0x57   : > { %v1180_v0 = vld [vmem:[%s284_s5] sm:$0xff]  ;;  %v1005_v2 = vmov 0.0   ;;  %v368_v4 = vld [vmem:[#allocation5 + $0x68] sm:$0xff]  ;;  %v367_v5 = vld [vmem:[#allocation5 + $0x60] sm:$0xff]  ;;  %v327_v6 = vlaneseq  ;;  %vm1006_vm1 = vmmov 0   ;;  %s668_s17 = sshll.u32 %s1069_s28, 7 }
  0x58   : > { %979 = vsyncadd (%p1294_p3), [#allocation6], 4294963200  ;;  %324 = vadd.xlane.f32.xlu0 %v1180_v0  ;;  %v370_v1 = vld [vmem:[#allocation5 + $0x78] sm:$0xff]  ;;  %705 = vmatprep.subr.mxu0 %v1005_v2  ;;  %v369_v3 = vld [vmem:[#allocation5 + $0x70] sm:$0xff]  ;;  %s322_s15 = scalar_lea.vmem [#allocation8], %s659_s10  ;;  %s560_s5 = scalar_lea.hbm %s1275_s7, %s668_s17 }
  0x59   : > { %740 = vmatprep.subr.mxu1 %v1005_v2  ;;  %706 = vmatpush3.msra.mxu0 %v370_v1  ;;  %v328_v7 = vand.u32 127, %v327_v6  ;;  %v366_v13 = vld [vmem:[#allocation5 + $0x58] sm:$0xff]  ;;  %v365_v14 = vld [vmem:[#allocation5 + $0x50] sm:$0xff]  ;;  %v364_v15 = vld [vmem:[#allocation5 + $0x48] sm:$0xff]  ;;  %s562_s19 = sshll.u32 %s322_s15, 4  ;;  %s549_s30 = scalar_lea.sflag [#allocation4], %s1166_s29  ;;  %s563_s19 = int_to_ptr.vmem [resolvable:$true] %s562_s19 }
  0x5a   : > { %707 = vmatprep.subr.mxu0 %v1005_v2  ;;  %v363_v16 = vld [vmem:[#allocation5 + $0x40] sm:$0xff]  ;;  %737 = vmatprep.mubr.msk.f32.mxu0 %vm1006_vm1, %v1005_v2  ;;  %v362_v17 = vld [vmem:[#allocation5 + $0x38] sm:$0xff]  ;;  %v361_v18 = vld [vmem:[#allocation5 + $0x30] sm:$0xff]  ;;  %s930_s9 = scalar_lea.vmem %s563_s19, 128  ;;  %p1295_p0 = scmp.ne.s32.totalorder %s1289_s11, 0 }
  0x5b   : > { %708 = vmatpush3.msra.mxu0 %v369_v3  ;;  %vm329_vm0 = vcmp.lt.s32.totalorder %v328_v7, 32  ;;  %772 = vmatprep.mubr.msk.f32.mxu1 %vm1006_vm1, %v1005_v2  ;;  %v360_v19 = vld [vmem:[#allocation5 + $0x28] sm:$0xff]  ;;  %v359_v20 = vld [vmem:[#allocation5 + $0x20] sm:$0xff]  ;;  %v358_v21 = vld [vmem:[#allocation5 + $0x18] sm:$0xff]  ;;  %p931_p11 = scmp.ne.s32.totalorder %s563_s19, %s930_s9  ;;  %s1007_s28 = smov [#allocation8]  }
  0x5c   : > { %709 = vmatprep.subr.mxu0 %v1005_v2  ;;  %v357_v22 = vld [vmem:[#allocation5 + $0x10] sm:$0xff]  ;;  %v356_v23 = vld [vmem:[#allocation5 + $0x8] sm:$0xff]  ;;  %v355_v24 = vld [vmem:[#allocation5] sm:$0xff]  ;;  %s934_s18 = sshll.u32 %s1007_s28, 4  ;;  %s935_s18 = int_to_ptr.vmem [resolvable:$false] %s934_s18 }
  0x5d   : > { %710 = vmatpush3.msra.mxu0 %v368_v4  ;;  %v387_v25 = vld [vmem:[#allocation7 + $0x78] sm:$0xff]  ;;  %v386_v26 = vld [vmem:[#allocation7 + $0x70] sm:$0xff]  ;;  %v385_v27 = vld [vmem:[#allocation7 + $0x68] sm:$0xff]  ;;  %p932_p1 = pnand %p931_p11, %p1295_p0  ;;  %s936_s10 = scalar_lea.vmem %s935_s18, 256 }
  0x5e   : > { %711 = vmatprep.subr.mxu0 %v1005_v2  ;;  %741 = vmatpush3.msra.mxu1 %v387_v25  ;;  %v384_v28 = vld [vmem:[#allocation7 + $0x60] sm:$0xff]  ;;  %v663_v33 = vld [vmem:[%s1269_s1] ss:$0 sm:$0xff]  ;;  %v383_v38 = vld [vmem:[#allocation7 + $0x58] sm:$0xff]  ;;  %p937_p6 = scmp.lt.s32.totalorder %s563_s19, %s935_s18  ;;  %p938_p12 = scmp.lt.s32.totalorder %s936_s10, %s930_s9 }
  0x5f   : > { %712 = vmatpush3.msra.mxu0 %v367_v5  ;;  %742 = vmatprep.subr.mxu1 %v1005_v2  ;;  %v664_v35 = vld [vmem:[%s1270_s2] ss:$0 sm:$0xff]  ;;  %v381_v40 = vld [vmem:[#allocation7 + $0x48] sm:$0xff]  ;;  %v380_v41 = vld [vmem:[#allocation7 + $0x40] sm:$0xff]  ;;  %p933_p2 = pneg %p932_p1 }
  0x60   : > { %713 = vmatprep.subr.mxu0 %v1005_v2  ;;  %743 = vmatpush3.msra.mxu1 %v386_v26  ;;  %v382_v39 = vld [vmem:[#allocation7 + $0x50] sm:$0xff]  ;;  %v379_v42 = vld [vmem:[#allocation7 + $0x38] sm:$0xff]  ;;  %v377_v44 = vld [vmem:[#allocation7 + $0x28] sm:$0xff]  ;;  %p939_p7 = por %p938_p12, %p937_p6 }
  0x61   : > { %714 = vmatpush3.msra.mxu0 %v366_v13  ;;  %744 = vmatprep.subr.mxu1 %v1005_v2  ;;  %v378_v43 = vld [vmem:[#allocation7 + $0x30] sm:$0xff]  ;;  %v376_v45 = vld [vmem:[#allocation7 + $0x20] sm:$0xff]  ;;  %v375_v46 = vld [vmem:[#allocation7 + $0x18] sm:$0xff] }
  0x62   : > { %715 = vmatprep.subr.mxu0 %v1005_v2  ;;  %745 = vmatpush3.msra.mxu1 %v385_v27  ;;  %v374_v47 = vld [vmem:[#allocation7 + $0x10] sm:$0xff]  ;;  %v373_v48 = vld [vmem:[#allocation7 + $0x8] sm:$0xff]  ;;  %v372_v49 = vld [vmem:[#allocation7] sm:$0xff]  ;;  %p940_p9 = pnand %p939_p7, %p933_p2 }
  0x63   : > { %716 = vmatpush3.msra.mxu0 %v365_v14  ;;  %746 = vmatprep.subr.mxu1 %v1005_v2  ;;  %v665_v50 = vld [vmem:[%s1272_s4] ss:$0 sm:$0xff] }
  0x64   : > { %717 = vmatprep.subr.mxu0 %v1005_v2  ;;  %747 = vmatpush3.msra.mxu1 %v384_v28  ;;  %v666_v59 = vld [vmem:[%s1274_s6] ss:$0 sm:$0xff] }
  0x65   : > { %718 = vmatpush3.msra.mxu0 %v364_v15  ;;  %748 = vmatprep.subr.mxu1 %v1005_v2 }
  0x66   : > { %719 = vmatprep.subr.mxu0 %v1005_v2  ;;  %749 = vmatpush3.msra.mxu1 %v383_v38 }
  0x67   : > { %720 = vmatpush3.msra.mxu0 %v363_v16  ;;  %750 = vmatprep.subr.mxu1 %v1005_v2 }
  0x68   : > { %721 = vmatprep.subr.mxu0 %v1005_v2  ;;  %751 = vmatpush3.msra.mxu1 %v382_v39 }
  0x69   : > { %722 = vmatpush3.msra.mxu0 %v362_v17  ;;  %752 = vmatprep.subr.mxu1 %v1005_v2 }
  0x6a   : > { %723 = vmatprep.subr.mxu0 %v1005_v2  ;;  %753 = vmatpush3.msra.mxu1 %v381_v40 }
  0x6b   : > { %724 = vmatpush3.msra.mxu0 %v361_v18  ;;  %754 = vmatprep.subr.mxu1 %v1005_v2 }
  0x6c   : > { %725 = vmatprep.subr.mxu0 %v1005_v2  ;;  %755 = vmatpush3.msra.mxu1 %v380_v41 }
  0x6d   : > { %726 = vmatpush3.msra.mxu0 %v360_v19  ;;  %756 = vmatprep.subr.mxu1 %v1005_v2 }
  0x6e   : > { %727 = vmatprep.subr.mxu0 %v1005_v2  ;;  %757 = vmatpush3.msra.mxu1 %v379_v42 }
  0x6f   : > { %728 = vmatpush3.msra.mxu0 %v359_v20  ;;  %758 = vmatprep.subr.mxu1 %v1005_v2 }
  0x70   : > { %729 = vmatprep.subr.mxu0 %v1005_v2  ;;  %759 = vmatpush3.msra.mxu1 %v378_v43 }
  0x71   : > { %730 = vmatpush3.msra.mxu0 %v358_v21  ;;  %760 = vmatprep.subr.mxu1 %v1005_v2 }
  0x72   : > { %731 = vmatprep.subr.mxu0 %v1005_v2  ;;  %761 = vmatpush3.msra.mxu1 %v377_v44 }
  0x73   : > { %732 = vmatpush3.msra.mxu0 %v357_v22  ;;  %762 = vmatprep.subr.mxu1 %v1005_v2 }
  0x74   : > { %733 = vmatprep.subr.mxu0 %v1005_v2  ;;  %763 = vmatpush3.msra.mxu1 %v376_v45 }
  0x75   : > { %734 = vmatpush3.msra.mxu0 %v356_v23  ;;  %764 = vmatprep.subr.mxu1 %v1005_v2 }
  0x76   : > { %735 = vmatprep.subr.mxu0 %v1005_v2  ;;  %765 = vmatpush3.msra.mxu1 %v375_v46 }
  0x77   : > { %736 = vmatpush3.msra.mxu0 %v355_v24  ;;  %766 = vmatprep.subr.mxu1 %v1005_v2 }
  0x78   : > { %767 = vmatpush3.msra.mxu1 %v374_v47 }
  0x79   : > { %768 = vmatprep.subr.mxu1 %v1005_v2 }
  0x7a   : > { %769 = vmatpush3.msra.mxu1 %v373_v48 }
  0x7b   : > { %770 = vmatprep.subr.mxu1 %v1005_v2 }
  0x7c   : > { %771 = vmatpush3.msra.mxu1 %v372_v49 }
  0xe1   : > { %v325_v8 = vpop.xlane.xlu0 %324 }
  0xe2   : > { %v326_v9 = vmul.f32 0.03125, %v325_v8 }
  0xe4   : > { %v330_v10 = vsub.f32 %v1180_v0, %v326_v9 }
  0xe6   : > { %v331_v11 = vsel %vm329_vm0, %v330_v10, 0.0 }
  0xe7   : > { %v332_v12 = vmul.f32 %v331_v11, %v331_v11 }
  0xe9   : > { %333 = vadd.xlane.f32.xlu0 %v332_v12 }
 0x172   : > { %v334_v29 = vpop.xlane.xlu0 %333 }
 0x173   : > { %v335_v30 = vmul.f32 0.03125, %v334_v29 }
 0x175   : > { %v336_v31 = vadd.f32 1e-05, %v335_v30 }
 0x177   : > { %846 = vrsqrt.f32 %v336_v31 }
 0x184   : > { %v847_v32 = vpop.eup %846 }
 0x185   : > { %v338_v34 = vmul.f32 %v847_v32, %v331_v11 }
 0x187   : > { %v346_v36 = vmul.f32 %v663_v33, %v338_v34 }
 0x189   : > { %v354_v37 = vadd.f32 %v664_v35, %v346_v36 }
 0x18b   : > { %738 = vmatmul.mubr.f32.vlgmr.msra.gmra.mxu0 %v354_v37 }
 0x24b   : > { %v460_v51 = vpop.f32.mrf.mxu0 }
 0x24c   : > { %v461_v52 = vadd.f32 %v665_v50, %v460_v51 }
 0x24d   : > { %v739_v53 = vpop.f32.mrf.mxu0 }
 0x24e   : > { %v465_v54 = vmul.f32 0.70710677, %v461_v52  ;;  %v464_v56 = vmul.f32 0.5, %v461_v52 }
 0x250   : > { %848 = verf.f32 %v465_v54 }
 0x25d   : > { %v849_v55 = vpop.eup %848 }
 0x25e   : > { %v467_v57 = vadd.f32 1.0, %v849_v55 }
 0x260   : > { %v468_v58 = vmul.f32 %v467_v57, %v464_v56 }
 0x262   : > { %773 = vmatmul.mubr.f32.vlgmr.msra.gmra.mxu1 %v468_v58 }
 0x322   : > { %v542_v60 = vpop.f32.mrf.mxu1 }
 0x323   : > { %v543_v61 = vadd.f32 %v666_v59, %v542_v60 }
 0x324   : > { %v774_v62 = vpop.f32.mrf.mxu1 }
 0x325   : > { %v546_v63 = vadd.f32 %v543_v61, %v1180_v0 }
 0x327   : > { %547 = vst [vmem:[%s322_s15] sm:$0xff] %v546_v63 }
 0x328   : > { %943 = shalt.err (!%p940_p9)
}
 0x329   : > { %s944_s20 = scalar_lea.hbm %s560_s5, 128  ;;  %s948_s22 = scalar_lea.hbm %s1275_s7, 256 }
 0x32a   : > { %p945_p13 = scmp.ne.s32.totalorder %s560_s5, %s944_s20  ;;  %p949_p4 = scmp.lt.s32.totalorder %s560_s5, %s1275_s7 }
 0x32b   : > { %p950_p8 = scmp.lt.s32.totalorder %s948_s22, %s944_s20 }
 0x32c   : > { %p946_p5 = pnand %p945_p13, %p1295_p0 }
 0x32d   : > { %p951_p3 = por %p950_p8, %p949_p4 }
 0x32e   : > { %p947_p10 = pneg %p946_p5 }
 0x330   : > { %p952_p11 = pnand %p951_p3, %p947_p10 }
 0x332   : > { %955 = shalt.err (!%p952_p11)
}
 0x333   : > { %785 = dma.vmem_to_hbm [thread:$0]  (%p1295_p0), %s563_s19, 128, %s560_s5, %s549_s30  }
 0x334 PF: > { %s574_s17 = sand.u32 1, %s986_s24   ;;  %p1296_p1 = scmp.ne.s32.totalorder %s1283_s8, 0 }
 0x335   : > { %p1297_p2 = scmp.ge.s32.totalorder %s998_s27, 2  ;;  %s575_s15 = scalar_lea.sflag [#allocation4], %s574_s17 }
 0x337   : > { %p799_p6 = pnand %p1297_p2, %p1296_p1 }
 0x339   : > { %p800_p12 = pneg %p799_p6 }
 0x33b   : > { %981 = dma.done.wait (%p800_p12), %s575_s15, 128  }
 0x33c   : > { %983 = vsyncadd (%p800_p12), %s575_s15, 4294967168  ;;  %p21_p7 = scmp.ge.s32.totalorder %s1120_s23, 4   ;;  %s1298_s24 = smov %s990_s25 }
 0x33d   : > { %s1299_s25 = smov %s994_s26  ;;  %s1300_s26 = smov %s1136_s12 }
 0x33e   : > { %s1301_s27 = smov %s1120_s23  ;;  %23 = sbr.rel (!%p21_p7) target bundleno = 9 (0x9), region = 101 }
 0x343   :  { %580 = vsyncpa [#allocation3], 1 }
 0x344   :  { %582 = vsyncpa [#allocation3 + $0x1], 1 }
 0x345   :  { %583 = vsyncpa [#allocation6], 1 }
 0x346   :  { %584 = vsyncpa [#allocation4], 1 }
 0x347   :  { %586 = vsyncpa [#allocation4 + $0x1], 1 }

// kernel: tpu_custom_call.1
= control target key start
LH: loop header
LB: loop body
LE: loop exit
PB: predicated region body
PF: predicated region fallthrough
CT: control target
= control target key end

     0   :  { %s1268_s0 = inlined_call_operand.hbm [shape: f32[16,128], index: 0, kind: input, shape index: {}]   ;;  %s1269_s1 = inlined_call_operand.vmem [shape: f32[1,128], index: 1, kind: input, shape index: {}]   ;;  %s1270_s2 = inlined_call_operand.vmem [shape: f32[1,128], index: 2, kind: input, shape index: {}]   ;;  %s1271_s3 = inlined_call_operand.hbm [shape: f32[128,128], index: 3, kind: input, shape index: {}]   ;;  %s1272_s4 = inlined_call_operand.vmem [shape: f32[1,128], index: 4, kind: input, shape index: {}]   ;;  %s1273_s5 = inlined_call_operand.hbm [shape: f32[128,128], index: 5, kind: input, shape index: {}]   ;;  %s1274_s6 = inlined_call_operand.vmem [shape: f32[1,128], index: 6, kind: input, shape index: {}]   ;;  %s1275_s7 = inlined_call_operand.hbm [shape: f32[16,128], index: 7, kind: output, shape index: {}]  }
   0x1   :  { %1280 = sst [smem:[#allocation12_spill]] %s1271_s3 }
   0x2   :  { %1281 = sst [smem:[#allocation13_spill]] %s1273_s5 }
   0x3   :  { %12 = vsyncpa [#allocation3], 0 }
   0x4   :  { %14 = vsyncpa [#allocation3 + $0x1], 0 }
   0x5   :  { %15 = vsyncpa [#allocation6], 0 }
   0x6   :  { %16 = vsyncpa [#allocation4], 0 }
   0x7   :  { %18 = vsyncpa [#allocation4 + $0x1], 0  ;;  %s1048_s24 = smov 0   ;;  %s1050_s25 = smov 0  }
   0x8   :  { %s1052_s26 = smov 0   ;;  %s1054_s27 = smov 0  }
   0x9 LB: > { %s1069_s28 = sadd.s32 4294967295, %s998_s27   ;;  %s651_s29 = sadd.s32 4294967294, %s998_s27   ;;  %s998_s27 = sphi %s1054_s27, %s1301_s27   ;;  %s994_s26 = sphi %s1052_s26, %s1300_s26   ;;  %s990_s25 = sphi %s1050_s25, %s1299_s25   ;;  %s986_s24 = sphi %s1048_s24, %s1298_s24  }
   0xa   : > { %p44_p0 = scmp.ne.s32.totalorder %s990_s25, %s986_s24  ;;  %p1276_p1 = scmp.eq.s32.totalorder %s1069_s28, 0 }
   0xb   : > { %p200_p3 = scmp.eq.s32.totalorder %s651_s29, 1  ;;  %p652_p5 = scmp.ge.s32.totalorder %s998_s27, 1 }
   0xc   : > { %p1078_p4 = por %p1276_p1, %p44_p0  ;;  %p207_p7 = scmp.lt.s32.totalorder %s998_s27, 3 }
   0xd   : > { %p1083_p6 = por %p200_p3, %p44_p0  ;;  %s1000_s10 = smov [#allocation5]  }
   0xe   : > { %s1282_s30 = scalar_select %p1078_p4, 1, 0 }
   0xf   : > { %s1283_s8 = scalar_select %p1083_p6, 1, 0 }
  0x10   : > { %p1088_p8 = pnand %p652_p5, %p207_p7  ;;  %s225_s11 = sshll.u32 %s1000_s10, 4  ;;  %s226_s11 = int_to_ptr.vmem [resolvable:$true] %s225_s11 }
  0x11   : > { %s1001_s13 = smov [#allocation7]   ;;  %s861_s15 = scalar_lea.vmem %s226_s11, 2048 }
  0x12   : > { %s1284_s9 = scalar_select %p1088_p8, 1, 0 }
  0x13   : > { %p787_p9 = pneg %p1088_p8  ;;  %s241_s14 = sshll.u32 %s1001_s13, 4  ;;  %s242_s14 = int_to_ptr.vmem [resolvable:$true] %s241_s14 }
  0x14   : > { %p862_p13 = scmp.ne.s32.totalorder %s226_s11, %s861_s15  ;;  %p869_p5 = scmp.lt.s32.totalorder %s226_s11, %s226_s11 }
  0x15   : > { %p1097_p11 = pnand %p787_p9, %p1276_p1  ;;  %p870_p7 = scmp.lt.s32.totalorder %s861_s15, %s861_s15 }
  0x17   : > { %p852_p12 = pneg %p1097_p11  ;;  %p871_p10 = por %p870_p7, %p869_p5 }
  0x19   : > { %p864_p0 = pnand %p862_p13, %p852_p12 }
  0x1b   : > { %p865_p3 = pneg %p864_p0 }
  0x1d   : > { %p872_p9 = pnand %p871_p10, %p865_p3 }
  0x1f   : > { %875 = shalt.err (!%p872_p9)
}
  0x20   : > { %s1002_s16 = smov 128   ;;  %s1003_s17 = smov 8  }
  0x21   : > { %s1286_s3 = sld [smem:[#allocation12_spill]]  ;;  %s887_s20 = scalar_lea.vmem %s242_s14, 2048 }
  0x22   : > { %p888_p1 = scmp.ne.s32.totalorder %s242_s14, %s887_s20  ;;  %p895_p2 = scmp.lt.s32.totalorder %s242_s14, %s242_s14 }
  0x23   : > { %p896_p6 = scmp.lt.s32.totalorder %s887_s20, %s887_s20 }
  0x24   : > { %p890_p13 = pnand %p888_p1, %p852_p12 }
  0x25   : > { %p897_p5 = por %p896_p6, %p895_p2 }
  0x26   : > { %p891_p0 = pneg %p890_p13 }
  0x27   : > { %790 = dma.hbm_to_vmem [thread:$0]  (!%p1097_p11), %s1286_s3, 2048, %s226_s11, [#allocation6], %s1002_s16, %s1002_s16, %s1003_s17  }
  0x28   : > { %p898_p10 = pnand %p897_p5, %p891_p0 }
  0x2a   : > { %901 = shalt.err (!%p898_p10)
}
  0x2b   : > { %s1287_s5 = sld [smem:[#allocation13_spill]]  ;;  %s1120_s23 = sadd.s32 1, %s998_s27  }
  0x2c   : > { %s31_s29 = sadd.s32 1, %s994_s26  ;;  %s28_s10 = ssub.s32 %s998_s27, %s1120_s23 }
  0x2d   : > { %p38_p1 = scmp.ne.s32.totalorder %s994_s26, %s990_s25  ;;  %p29_p2 = scmp.eq.s32.totalorder %s28_s10, 0 }
  0x2e   : > { %p39_p6 = scmp.eq.s32.totalorder %s998_s27, 0  ;;  %p1288_p12 = scmp.eq.s32.totalorder %s1069_s28, 1 }
  0x2f   : > { %p804_p7 = scmp.lt.s32.totalorder %s998_s27, 2  ;;  %s258_s13 = sand.u32 1, %s994_s26  }
  0x30   : > { %p1130_p3 = por %p1288_p12, %p38_p1  ;;  %p40_p9 = por %p39_p6, %p38_p1 }
  0x31   : > { %793 = dma.hbm_to_vmem [thread:$0]  (!%p1097_p11), %s1287_s5, 2048, %s242_s14, [#allocation6], %s1002_s16, %s1002_s16, %s1003_s17  }
  0x32   : > { %s1289_s11 = scalar_select %p1130_p3, 1, 0 }
  0x33   : > { %s1136_s12 = scalar_select %p29_p2, %s994_s26, %s31_s29  }
  0x34   : > { %s656_s15 = sshll.u32 %s258_s13, 3  ;;  %s657_s14 = sshll.u32 %s998_s27, 7 }
  0x35   : > { %s1143_s18 = scalar_lea.hbm %s1268_s0, %s657_s14  ;;  %s262_s19 = scalar_lea.vmem [#allocation2], %s656_s15 }
  0x36   : > { %s269_s20 = sshll.u32 %s262_s19, 4  ;;  %p1145_p11 = pnand %p804_p7, %p40_p9  ;;  %s270_s20 = int_to_ptr.vmem [resolvable:$true] %s269_s20 }
  0x37   : > { %s259_s22 = scalar_lea.sflag [#allocation3], %s258_s13  ;;  %s902_s29 = scalar_lea.hbm %s1143_s18, 128 }
  0x38   : > { %p903_p13 = scmp.ne.s32.totalorder %s1143_s18, %s902_s29  ;;  %p904_p0 = pneg %p1145_p11 }
  0x39   : > { %s907_s16 = scalar_lea.hbm %s1268_s0, 256  ;;  %p908_p1 = scmp.lt.s32.totalorder %s1143_s18, %s1268_s0 }
  0x3a   : > { %p905_p5 = pnand %p904_p0, %p903_p13  ;;  %p909_p2 = scmp.lt.s32.totalorder %s907_s16, %s902_s29 }
  0x3c   : > { %p906_p10 = pneg %p905_p5  ;;  %p910_p6 = por %p909_p2, %p908_p1 }
  0x3e   : > { %p911_p12 = pnand %p910_p6, %p906_p10 }
  0x40   : > { %914 = shalt.err (!%p911_p12)
}
  0x41   : > { %s915_s19 = scalar_lea.vmem %s270_s20, 128  ;;  %s1004_s13 = smov [#allocation2]  }
  0x42   : > { %p916_p7 = scmp.ne.s32.totalorder %s270_s20, %s915_s19  ;;  %s920_s3 = sshll.u32 %s1004_s13, 4  ;;  %s921_s3 = int_to_ptr.vmem [resolvable:$false] %s920_s3 }
  0x43   : > { %s922_s5 = scalar_lea.vmem %s921_s3, 256  ;;  %p923_p13 = scmp.lt.s32.totalorder %s270_s20, %s921_s3 }
  0x44   : > { %p918_p9 = pnand %p916_p7, %p904_p0  ;;  %p924_p5 = scmp.lt.s32.totalorder %s922_s5, %s915_s19 }
  0x46   : > { %p919_p3 = pneg %p918_p9  ;;  %p925_p4 = por %p924_p5, %p923_p13 }
  0x48   : > { %p926_p8 = pnand %p925_p4, %p919_p3 }
  0x4a   : > { %929 = shalt.err (!%p926_p8)
}
  0x4b   : > { %797 = dma.hbm_to_vmem [thread:$0]  (!%p1145_p11), %s1143_s18, 128, %s270_s20, %s259_s22  }
  0x4c   : > { %p1291_p10 = scmp.ne.s32.totalorder %s1284_s9, 0 }
  0x4d   : > { %s1166_s29 = sand.u32 (!%p1291_p10), 1, %s990_s25   ;;  %p1292_p4 = scmp.ne.s32.totalorder (!%p1291_p10), %s1282_s30, 0 }
  0x4e   : > { %278 = sbr.rel (%p1291_p10) target bundleno = 820 (0x334), region = 48  ;;  %s659_s10 = sshll.u32 (!%p1291_p10), %s1166_s29, 3 }
  0x4f   : > { %s281_s3 = scalar_lea.sflag (!%p1291_p10), [#allocation3], %s1166_s29  ;;  %s284_s5 = scalar_lea.vmem (!%p1291_p10), [#allocation2], %s659_s10 }
  0x53   : > { %973 = dma.done.wait (%p1292_p4), %s281_s3, 128  }
  0x54   : > { %975 = vsyncadd (%p1292_p4), %s281_s3, 4294967168  ;;  %p1293_p8 = scmp.eq.s32.totalorder %s1069_s28, 0 }
  0x56   : > { %977 = dma.done.wait (%p1293_p8), [#allocation6], 4096   ;;  %p1294_p3 = pmov %p1293_p8 }
  0x57   : > { %v1180_v0 = vld [vmem:[%s284_s5] sm:$0xff]  ;;  %v1005_v2 = vmov 0.0   ;;  %v368_v4 = vld [vmem:[#allocation5 + $0x68] sm:$0xff]  ;;  %v367_v5 = vld [vmem:[#allocation5 + $0x60] sm:$0xff]  ;;  %v327_v6 = vlaneseq  ;;  %vm1006_vm1 = vmmov 0   ;;  %s668_s17 = sshll.u32 %s1069_s28, 7 }
  0x58   : > { %979 = vsyncadd (%p1294_p3), [#allocation6], 4294963200  ;;  %324 = vadd.xlane.f32.xlu0 %v1180_v0  ;;  %v370_v1 = vld [vmem:[#allocation5 + $0x78] sm:$0xff]  ;;  %705 = vmatprep.subr.mxu0 %v1005_v2  ;;  %v369_v3 = vld [vmem:[#allocation5 + $0x70] sm:$0xff]  ;;  %s322_s15 = scalar_lea.vmem [#allocation8], %s659_s10  ;;  %s560_s5 = scalar_lea.hbm %s1275_s7, %s668_s17 }
  0x59   : > { %740 = vmatprep.subr.mxu1 %v1005_v2  ;;  %706 = vmatpush3.msra.mxu0 %v370_v1  ;;  %v328_v7 = vand.u32 127, %v327_v6  ;;  %v366_v13 = vld [vmem:[#allocation5 + $0x58] sm:$0xff]  ;;  %v365_v14 = vld [vmem:[#allocation5 + $0x50] sm:$0xff]  ;;  %v364_v15 = vld [vmem:[#allocation5 + $0x48] sm:$0xff]  ;;  %s562_s19 = sshll.u32 %s322_s15, 4  ;;  %s549_s30 = scalar_lea.sflag [#allocation4], %s1166_s29  ;;  %s563_s19 = int_to_ptr.vmem [resolvable:$true] %s562_s19 }
  0x5a   : > { %707 = vmatprep.subr.mxu0 %v1005_v2  ;;  %v363_v16 = vld [vmem:[#allocation5 + $0x40] sm:$0xff]  ;;  %737 = vmatprep.mubr.msk.f32.mxu0 %vm1006_vm1, %v1005_v2  ;;  %v362_v17 = vld [vmem:[#allocation5 + $0x38] sm:$0xff]  ;;  %v361_v18 = vld [vmem:[#allocation5 + $0x30] sm:$0xff]  ;;  %s930_s9 = scalar_lea.vmem %s563_s19, 128  ;;  %p1295_p0 = scmp.ne.s32.totalorder %s1289_s11, 0 }
  0x5b   : > { %708 = vmatpush3.msra.mxu0 %v369_v3  ;;  %vm329_vm0 = vcmp.lt.s32.totalorder %v328_v7, 32  ;;  %772 = vmatprep.mubr.msk.f32.mxu1 %vm1006_vm1, %v1005_v2  ;;  %v360_v19 = vld [vmem:[#allocation5 + $0x28] sm:$0xff]  ;;  %v359_v20 = vld [vmem:[#allocation5 + $0x20] sm:$0xff]  ;;  %v358_v21 = vld [vmem:[#allocation5 + $0x18] sm:$0xff]  ;;  %p931_p11 = scmp.ne.s32.totalorder %s563_s19, %s930_s9  ;;  %s1007_s28 = smov [#allocation8]  }
  0x5c   : > { %709 = vmatprep.subr.mxu0 %v1005_v2  ;;  %v357_v22 = vld [vmem:[#allocation5 + $0x10] sm:$0xff]  ;;  %v356_v23 = vld [vmem:[#allocation5 + $0x8] sm:$0xff]  ;;  %v355_v24 = vld [vmem:[#allocation5] sm:$0xff]  ;;  %s934_s18 = sshll.u32 %s1007_s28, 4  ;;  %s935_s18 = int_to_ptr.vmem [resolvable:$false] %s934_s18 }
  0x5d   : > { %710 = vmatpush3.msra.mxu0 %v368_v4  ;;  %v387_v25 = vld [vmem:[#allocation7 + $0x78] sm:$0xff]  ;;  %v386_v26 = vld [vmem:[#allocation7 + $0x70] sm:$0xff]  ;;  %v385_v27 = vld [vmem:[#allocation7 + $0x68] sm:$0xff]  ;;  %p932_p1 = pnand %p931_p11, %p1295_p0  ;;  %s936_s10 = scalar_lea.vmem %s935_s18, 256 }
  0x5e   : > { %711 = vmatprep.subr.mxu0 %v1005_v2  ;;  %741 = vmatpush3.msra.mxu1 %v387_v25  ;;  %v384_v28 = vld [vmem:[#allocation7 + $0x60] sm:$0xff]  ;;  %v663_v33 = vld [vmem:[%s1269_s1] ss:$0 sm:$0xff]  ;;  %v383_v38 = vld [vmem:[#allocation7 + $0x58] sm:$0xff]  ;;  %p937_p6 = scmp.lt.s32.totalorder %s563_s19, %s935_s18  ;;  %p938_p12 = scmp.lt.s32.totalorder %s936_s10, %s930_s9 }
  0x5f   : > { %712 = vmatpush3.msra.mxu0 %v367_v5  ;;  %742 = vmatprep.subr.mxu1 %v1005_v2  ;;  %v664_v35 = vld [vmem:[%s1270_s2] ss:$0 sm:$0xff]  ;;  %v381_v40 = vld [vmem:[#allocation7 + $0x48] sm:$0xff]  ;;  %v380_v41 = vld [vmem:[#allocation7 + $0x40] sm:$0xff]  ;;  %p933_p2 = pneg %p932_p1 }
  0x60   : > { %713 = vmatprep.subr.mxu0 %v1005_v2  ;;  %743 = vmatpush3.msra.mxu1 %v386_v26  ;;  %v382_v39 = vld [vmem:[#allocation7 + $0x50] sm:$0xff]  ;;  %v379_v42 = vld [vmem:[#allocation7 + $0x38] sm:$0xff]  ;;  %v377_v44 = vld [vmem:[#allocation7 + $0x28] sm:$0xff]  ;;  %p939_p7 = por %p938_p12, %p937_p6 }
  0x61   : > { %714 = vmatpush3.msra.mxu0 %v366_v13  ;;  %744 = vmatprep.subr.mxu1 %v1005_v2  ;;  %v378_v43 = vld [vmem:[#allocation7 + $0x30] sm:$0xff]  ;;  %v376_v45 = vld [vmem:[#allocation7 + $0x20] sm:$0xff]  ;;  %v375_v46 = vld [vmem:[#allocation7 + $0x18] sm:$0xff] }
  0x62   : > { %715 = vmatprep.subr.mxu0 %v1005_v2  ;;  %745 = vmatpush3.msra.mxu1 %v385_v27  ;;  %v374_v47 = vld [vmem:[#allocation7 + $0x10] sm:$0xff]  ;;  %v373_v48 = vld [vmem:[#allocation7 + $0x8] sm:$0xff]  ;;  %v372_v49 = vld [vmem:[#allocation7] sm:$0xff]  ;;  %p940_p9 = pnand %p939_p7, %p933_p2 }
  0x63   : > { %716 = vmatpush3.msra.mxu0 %v365_v14  ;;  %746 = vmatprep.subr.mxu1 %v1005_v2  ;;  %v665_v50 = vld [vmem:[%s1272_s4] ss:$0 sm:$0xff] }
  0x64   : > { %717 = vmatprep.subr.mxu0 %v1005_v2  ;;  %747 = vmatpush3.msra.mxu1 %v384_v28  ;;  %v666_v59 = vld [vmem:[%s1274_s6] ss:$0 sm:$0xff] }
  0x65   : > { %718 = vmatpush3.msra.mxu0 %v364_v15  ;;  %748 = vmatprep.subr.mxu1 %v1005_v2 }
  0x66   : > { %719 = vmatprep.subr.mxu0 %v1005_v2  ;;  %749 = vmatpush3.msra.mxu1 %v383_v38 }
  0x67   : > { %720 = vmatpush3.msra.mxu0 %v363_v16  ;;  %750 = vmatprep.subr.mxu1 %v1005_v2 }
  0x68   : > { %721 = vmatprep.subr.mxu0 %v1005_v2  ;;  %751 = vmatpush3.msra.mxu1 %v382_v39 }
  0x69   : > { %722 = vmatpush3.msra.mxu0 %v362_v17  ;;  %752 = vmatprep.subr.mxu1 %v1005_v2 }
  0x6a   : > { %723 = vmatprep.subr.mxu0 %v1005_v2  ;;  %753 = vmatpush3.msra.mxu1 %v381_v40 }
  0x6b   : > { %724 = vmatpush3.msra.mxu0 %v361_v18  ;;  %754 = vmatprep.subr.mxu1 %v1005_v2 }
  0x6c   : > { %725 = vmatprep.subr.mxu0 %v1005_v2  ;;  %755 = vmatpush3.msra.mxu1 %v380_v41 }
  0x6d   : > { %726 = vmatpush3.msra.mxu0 %v360_v19  ;;  %756 = vmatprep.subr.mxu1 %v1005_v2 }
  0x6e   : > { %727 = vmatprep.subr.mxu0 %v1005_v2  ;;  %757 = vmatpush3.msra.mxu1 %v379_v42 }
  0x6f   : > { %728 = vmatpush3.msra.mxu0 %v359_v20  ;;  %758 = vmatprep.subr.mxu1 %v1005_v2 }
  0x70   : > { %729 = vmatprep.subr.mxu0 %v1005_v2  ;;  %759 = vmatpush3.msra.mxu1 %v378_v43 }
  0x71   : > { %730 = vmatpush3.msra.mxu0 %v358_v21  ;;  %760 = vmatprep.subr.mxu1 %v1005_v2 }
  0x72   : > { %731 = vmatprep.subr.mxu0 %v1005_v2  ;;  %761 = vmatpush3.msra.mxu1 %v377_v44 }
  0x73   : > { %732 = vmatpush3.msra.mxu0 %v357_v22  ;;  %762 = vmatprep.subr.mxu1 %v1005_v2 }
  0x74   : > { %733 = vmatprep.subr.mxu0 %v1005_v2  ;;  %763 = vmatpush3.msra.mxu1 %v376_v45 }
  0x75   : > { %734 = vmatpush3.msra.mxu0 %v356_v23  ;;  %764 = vmatprep.subr.mxu1 %v1005_v2 }
  0x76   : > { %735 = vmatprep.subr.mxu0 %v1005_v2  ;;  %765 = vmatpush3.msra.mxu1 %v375_v46 }
  0x77   : > { %736 = vmatpush3.msra.mxu0 %v355_v24  ;;  %766 = vmatprep.subr.mxu1 %v1005_v2 }
  0x78   : > { %767 = vmatpush3.msra.mxu1 %v374_v47 }
  0x79   : > { %768 = vmatprep.subr.mxu1 %v1005_v2 }
  0x7a   : > { %769 = vmatpush3.msra.mxu1 %v373_v48 }
  0x7b   : > { %770 = vmatprep.subr.mxu1 %v1005_v2 }
  0x7c   : > { %771 = vmatpush3.msra.mxu1 %v372_v49 }
  0xe1   : > { %v325_v8 = vpop.xlane.xlu0 %324 }
  0xe2   : > { %v326_v9 = vmul.f32 0.03125, %v325_v8 }
  0xe4   : > { %v330_v10 = vsub.f32 %v1180_v0, %v326_v9 }
  0xe6   : > { %v331_v11 = vsel %vm329_vm0, %v330_v10, 0.0 }
  0xe7   : > { %v332_v12 = vmul.f32 %v331_v11, %v331_v11 }
  0xe9   : > { %333 = vadd.xlane.f32.xlu0 %v332_v12 }
 0x172   : > { %v334_v29 = vpop.xlane.xlu0 %333 }
 0x173   : > { %v335_v30 = vmul.f32 0.03125, %v334_v29 }
 0x175   : > { %v336_v31 = vadd.f32 1e-05, %v335_v30 }
 0x177   : > { %846 = vrsqrt.f32 %v336_v31 }
 0x184   : > { %v847_v32 = vpop.eup %846 }
 0x185   : > { %v338_v34 = vmul.f32 %v847_v32, %v331_v11 }
 0x187   : > { %v346_v36 = vmul.f32 %v663_v33, %v338_v34 }
 0x189   : > { %v354_v37 = vadd.f32 %v664_v35, %v346_v36 }
 0x18b   : > { %738 = vmatmul.mubr.f32.vlgmr.msra.gmra.mxu0 %v354_v37 }
 0x24b   : > { %v460_v51 = vpop.f32.mrf.mxu0 }
 0x24c   : > { %v461_v52 = vadd.f32 %v665_v50, %v460_v51 }
 0x24d   : > { %v739_v53 = vpop.f32.mrf.mxu0 }
 0x24e   : > { %v465_v54 = vmul.f32 0.70710677, %v461_v52  ;;  %v464_v56 = vmul.f32 0.5, %v461_v52 }
 0x250   : > { %848 = verf.f32 %v465_v54 }
 0x25d   : > { %v849_v55 = vpop.eup %848 }
 0x25e   : > { %v467_v57 = vadd.f32 1.0, %v849_v55 }
 0x260   : > { %v468_v58 = vmul.f32 %v467_v57, %v464_v56 }
 0x262   : > { %773 = vmatmul.mubr.f32.vlgmr.msra.gmra.mxu1 %v468_v58 }
 0x322   : > { %v542_v60 = vpop.f32.mrf.mxu1 }
 0x323   : > { %v543_v61 = vadd.f32 %v666_v59, %v542_v60 }
 0x324   : > { %v774_v62 = vpop.f32.mrf.mxu1 }
 0x325   : > { %v546_v63 = vadd.f32 %v543_v61, %v1180_v0 }
 0x327   : > { %547 = vst [vmem:[%s322_s15] sm:$0xff] %v546_v63 }
 0x328   : > { %943 = shalt.err (!%p940_p9)
}
 0x329   : > { %s944_s20 = scalar_lea.hbm %s560_s5, 128  ;;  %s948_s22 = scalar_lea.hbm %s1275_s7, 256 }
 0x32a   : > { %p945_p13 = scmp.ne.s32.totalorder %s560_s5, %s944_s20  ;;  %p949_p4 = scmp.lt.s32.totalorder %s560_s5, %s1275_s7 }
 0x32b   : > { %p950_p8 = scmp.lt.s32.totalorder %s948_s22, %s944_s20 }
 0x32c   : > { %p946_p5 = pnand %p945_p13, %p1295_p0 }
 0x32d   : > { %p951_p3 = por %p950_p8, %p949_p4 }
 0x32e   : > { %p947_p10 = pneg %p946_p5 }
 0x330   : > { %p952_p11 = pnand %p951_p3, %p947_p10 }
 0x332   : > { %955 = shalt.err (!%p952_p11)
}
 0x333   : > { %785 = dma.vmem_to_hbm [thread:$0]  (%p1295_p0), %s563_s19, 128, %s560_s5, %s549_s30  }
 0x334 PF: > { %s574_s17 = sand.u32 1, %s986_s24   ;;  %p1296_p1 = scmp.ne.s32.totalorder %s1283_s8, 0 }
 0x335   : > { %p1297_p2 = scmp.ge.s32.totalorder %s998_s27, 2  ;;  %s575_s15 = scalar_lea.sflag [#allocation4], %s574_s17 }
 0x337   : > { %p799_p6 = pnand %p1297_p2, %p1296_p1 }
 0x339   : > { %p800_p12 = pneg %p799_p6 }
 0x33b   : > { %981 = dma.done.wait (%p800_p12), %s575_s15, 128  }
 0x33c   : > { %983 = vsyncadd (%p800_p12), %s575_s15, 4294967168  ;;  %p21_p7 = scmp.ge.s32.totalorder %s1120_s23, 4   ;;  %s1298_s24 = smov %s990_s25 }
 0x33d   : > { %s1299_s25 = smov %s994_s26  ;;  %s1300_s26 = smov %s1136_s12 }
 0x33e   : > { %s1301_s27 = smov %s1120_s23  ;;  %23 = sbr.rel (!%p21_p7) target bundleno = 9 (0x9), region = 101 }
 0x343   :  { %580 = vsyncpa [#allocation3], 1 }
 0x344   :  { %582 = vsyncpa [#allocation3 + $0x1], 1 }
 0x345   :  { %583 = vsyncpa [#allocation6], 1 }
 0x346   :  { %584 = vsyncpa [#allocation4], 1 }
 0x347   :  { %586 = vsyncpa [#allocation4 + $0x1], 1 }

</bundles_post_ra>
